<compile_context>
chip_gen: v7x
topology: tpu7x:2x2x1
jax: 0.10.0
libtpu: 0.0.40
codegen_flags: <defaults>
</compile_context>

<pallas_src>
import functools

import jax
import jax.numpy as jnp
from jax import lax
from jax.experimental import pallas as pl
from jax.experimental.pallas import tpu as pltpu

BF16 = jnp.bfloat16
F32 = jnp.float32
VMEM_LIMIT = 32 * 1024 * 1024   # safe on v5e/v6e/v7x; raises v5e's 16MiB default


def _round_up(n, m):
    return ((n + m - 1) // m) * m


def _pick_tile(total, max_size):
    """Largest divisor of `total` that is <= max_size and sublane friendly."""
    for cand in range(min(total, max_size), 0, -1):
        if total % cand == 0 and (cand % 8 == 0 or cand == total):
            return cand
    return total


def _pick_row_tile(H, W, max_px):
    """Largest row count TH dividing H with TH*W <= max_px (sublane friendly)."""
    for th in range(H, 0, -1):
        if H % th:
            continue
        px = th * W
        if px <= max_px and (px % 8 == 0 or th == H):
            return th
    return H


# ----------------------------------------------------------------------------
# Kernels
# ----------------------------------------------------------------------------

def head_conv_kernel(xp_ref, wa_ref, sca_ref, sha_ref, wc_ref, scc_ref, shc_ref,
                     f1_ref, f2_ref, *, TH, W, Cin):
    """conv5a & conv5c (3x3, pad=1, no bias) + folded BN + ReLU, one row tile."""
    r = pl.program_id(1)
    row0 = pl.multiple_of(r * TH, TH)
    blk = xp_ref[0, pl.ds(row0, TH + 2), :, :]          # (TH+2, W+2, Cin) bf16
    Cout = f1_ref.shape[-1]
    acc_a = jnp.zeros((TH * W, Cout), F32)
    acc_c = jnp.zeros((TH * W, Cout), F32)
    # TODO(synk): im2col single (TH*W, 9*Cin) contraction would give better MXU
    # cadence; the 9-tap bf16 loop is kept for robust Mosaic lowering.
    for dy in range(3):
        for dx in range(3):
            tap = blk[dy:dy + TH, dx:dx + W, :].reshape(TH * W, Cin)
            acc_a += jnp.dot(tap, wa_ref[dy, dx], preferred_element_type=F32)
            acc_c += jnp.dot(tap, wc_ref[dy, dx], preferred_element_type=F32)
    f1_ref[0] = jnp.maximum(acc_a * sca_ref[0] + sha_ref[0], 0.0).astype(f1_ref.dtype)
    f2_ref[0] = jnp.maximum(acc_c * scc_ref[0] + shc_ref[0], 0.0).astype(f2_ref.dtype)


def pam_kernel(fq_ref, fkv_ref, wq_ref, bq_ref, wk_ref, bk_ref, wv_ref, bv_ref,
               gamma_ref, o_ref, q_sc, m_sc, l_sc, acc_sc):
    """Flash-style position attention.  Grid (B, q_tiles, kv_tiles)."""
    kv = pl.program_id(2)

    @pl.when(kv == 0)
    def _init():
        q = jnp.dot(fq_ref[0], wq_ref[...], preferred_element_type=F32) + bq_ref[0]
        q_sc[...] = q.astype(q_sc.dtype)
        m_sc[...] = jnp.full(m_sc.shape, -jnp.inf, m_sc.dtype)
        l_sc[...] = jnp.zeros(l_sc.shape, l_sc.dtype)
        acc_sc[...] = jnp.zeros(acc_sc.shape, acc_sc.dtype)

    fkv = fkv_ref[0]                                    # (TK, C) bf16
    k = (jnp.dot(fkv, wk_ref[...], preferred_element_type=F32)
         + bk_ref[0]).astype(BF16)                      # (TK, c8p)
    v = (jnp.dot(fkv, wv_ref[...], preferred_element_type=F32)
         + bv_ref[0]).astype(BF16)                      # (TK, C)

    s = lax.dot_general(q_sc[...], k, (((1,), (1,)), ((), ())),
                        preferred_element_type=F32)     # (TQ, TK)
    m_new = jnp.maximum(m_sc[...], jnp.max(s, axis=-1, keepdims=True))
    alpha = jnp.exp(m_sc[...] - m_new)
    p = jnp.exp(s - m_new)
    l_sc[...] = alpha * l_sc[...] + jnp.sum(p, axis=-1, keepdims=True)
    acc_sc[...] = alpha * acc_sc[...] + jnp.dot(p.astype(BF16), v,
                                                preferred_element_type=F32)
    m_sc[...] = m_new

    @pl.when(kv == pl.num_programs(2) - 1)
    def _finalize():
        inv_l = pl.reciprocal(l_sc[...], approx=True)
        out = gamma_ref[0, 0] * (acc_sc[...] * inv_l) + fq_ref[0].astype(F32)
        o_ref[0] = out.astype(o_ref.dtype)


def cam_attn_kernel(feat_ref, attn_ref, gram_sc):
    """Channel attention map: gram over HW tiles, softmax(max - energy)."""
    t = pl.program_id(1)

    @pl.when(t == 0)
    def _init():
        gram_sc[...] = jnp.zeros(gram_sc.shape, gram_sc.dtype)

    f = feat_ref[0]                                     # (THW, C) bf16
    gram_sc[...] += lax.dot_general(f, f, (((0,), (0,)), ((), ())),
                                    preferred_element_type=F32)

    @pl.when(t == pl.num_programs(1) - 1)
    def _finalize():
        e = gram_sc[...]
        e_new = jnp.max(e, axis=-1, keepdims=True) - e
        p = jnp.exp(e_new - jnp.max(e_new, axis=-1, keepdims=True))
        attn = p * pl.reciprocal(jnp.sum(p, axis=-1, keepdims=True), approx=True)
        attn_ref[0] = attn.astype(attn_ref.dtype)


def cam_apply_kernel(feat_ref, attn_ref, gamma_ref, o_ref):
    f = feat_ref[0]                                     # (THW, C) bf16
    out = lax.dot_general(f, attn_ref[0], (((1,), (1,)), ((), ())),
                          preferred_element_type=F32)   # (THW, C)
    o_ref[0] = (gamma_ref[0, 0] * out + f.astype(F32)).astype(o_ref.dtype)


def tail_kernel(sa_ref, sc_ref, w51_ref, s51_ref, sh51_ref,
                w52_ref, s52_ref, sh52_ref, w8_ref, b8_ref,
                sum_ref, out_ref, *, TH, W, C):
    """conv51 + conv52 + sum + 1x1 conv8 fused, one row tile."""
    r = pl.program_id(1)
    row0 = pl.multiple_of(r * TH, TH)
    blk1 = sa_ref[0, pl.ds(row0, TH + 2), :, :]         # (TH+2, W+2, C) bf16
    blk2 = sc_ref[0, pl.ds(row0, TH + 2), :, :]
    C2 = sum_ref.shape[-1]
    acc1 = jnp.zeros((TH * W, C2), F32)
    acc2 = jnp.zeros((TH * W, C2), F32)
    for dy in range(3):
        for dx in range(3):
            t1 = blk1[dy:dy + TH, dx:dx + W, :].reshape(TH * W, C)
            t2 = blk2[dy:dy + TH, dx:dx + W, :].reshape(TH * W, C)
            acc1 += jnp.dot(t1, w51_ref[dy, dx], preferred_element_type=F32)
            acc2 += jnp.dot(t2, w52_ref[dy, dx], preferred_element_type=F32)
    y1 = jnp.maximum(acc1 * s51_ref[0] + sh51_ref[0], 0.0)
    y2 = jnp.maximum(acc2 * s52_ref[0] + sh52_ref[0], 0.0)
    s = y1 + y2                                         # (TH*W, C2) f32
    sum_ref[0] = s.astype(sum_ref.dtype)
    # TODO(synk): nn.Dropout2d(0.1) is inference-mode identity; training-mode
    # channel dropout is not implemented.
    out_ref[0] = (jnp.dot(s.astype(BF16), w8_ref[...], preferred_element_type=F32)
                  + b8_ref[0]).astype(out_ref.dtype)


# ----------------------------------------------------------------------------
# pallas_call wrappers
# ----------------------------------------------------------------------------

def head_convs(x_nhwc, wa, sca, sha, wc, scc, shc, *, max_tile_px=2048):
    B, H, W, Cin = x_nhwc.shape
    Cout = wa.shape[-1]
    TH = _pick_row_tile(H, W, max_tile_px)
    nR = H // TH
    xp = jnp.pad(x_nhwc, ((0, 0), (1, 1), (1, 1), (0, 0))).astype(BF16)
    kern = functools.partial(head_conv_kernel, TH=TH, W=W, Cin=Cin)
    wspec = pl.BlockSpec((3, 3, Cin, Cout), lambda b, r: (0, 0, 0, 0))
    vspec = pl.BlockSpec((1, Cout), lambda b, r: (0, 0))
    ospec = pl.BlockSpec((1, TH * W, Cout), lambda b, r: (b, r, 0))
    return pl.pallas_call(
        kern,
        out_shape=(jax.ShapeDtypeStruct((B, H * W, Cout), BF16),
                   jax.ShapeDtypeStruct((B, H * W, Cout), BF16)),
        grid=(B, nR),
        in_specs=[
            pl.BlockSpec((1, H + 2, W + 2, Cin), lambda b, r: (b, 0, 0, 0)),
            wspec, vspec, vspec, wspec, vspec, vspec,
        ],
        out_specs=(ospec, ospec),
        compiler_params=pltpu.CompilerParams(
            dimension_semantics=("parallel", "parallel"),
            vmem_limit_bytes=VMEM_LIMIT),
    )(xp, wa.astype(BF16), sca, sha, wc.astype(BF16), scc, shc)


def pam(feat, wq, bq, wk, bk, wv, bv, gamma, *, max_q=512, max_kv=512):
    B, HW, C = feat.shape
    c8 = wq.shape[-1]
    c8p = _round_up(c8, 128)          # lane-pad q/k projections (zeros -> same s)
    TQ = _pick_tile(HW, max_q)
    TK = _pick_tile(HW, max_kv)
    nQ, nK = HW // TQ, HW // TK
    wq_p = jnp.zeros((C, c8p), F32).at[:, :c8].set(wq).astype(BF16)
    wk_p = jnp.zeros((C, c8p), F32).at[:, :c8].set(wk).astype(BF16)
    bq_p = jnp.zeros((1, c8p), F32).at[:, :c8].set(bq)
    bk_p = jnp.zeros((1, c8p), F32).at[:, :c8].set(bk)
    return pl.pallas_call(
        pam_kernel,
        out_shape=jax.ShapeDtypeStruct((B, HW, C), BF16),
        grid=(B, nQ, nK),
        in_specs=[
            pl.BlockSpec((1, TQ, C), lambda b, qi, ki: (b, qi, 0)),
            pl.BlockSpec((1, TK, C), lambda b, qi, ki: (b, ki, 0)),
            pl.BlockSpec((C, c8p), lambda b, qi, ki: (0, 0)),
            pl.BlockSpec((1, c8p), lambda b, qi, ki: (0, 0)),
            pl.BlockSpec((C, c8p), lambda b, qi, ki: (0, 0)),
            pl.BlockSpec((1, c8p), lambda b, qi, ki: (0, 0)),
            pl.BlockSpec((C, C), lambda b, qi, ki: (0, 0)),
            pl.BlockSpec((1, C), lambda b, qi, ki: (0, 0)),
            pl.BlockSpec((1, 1), lambda b, qi, ki: (0, 0)),
        ],
        out_specs=pl.BlockSpec((1, TQ, C), lambda b, qi, ki: (b, qi, 0)),
        scratch_shapes=[
            pltpu.VMEM((TQ, c8p), BF16),      # q tile
            pltpu.VMEM((TQ, 1), F32),         # running max
            pltpu.VMEM((TQ, 1), F32),         # running denom
            pltpu.VMEM((TQ, C), F32),         # output accumulator
        ],
        compiler_params=pltpu.CompilerParams(
            dimension_semantics=("parallel", "parallel", "arbitrary"),
            vmem_limit_bytes=VMEM_LIMIT),
    )(feat, feat, wq_p, bq_p, wk_p, bk_p, wv.astype(BF16), bv, gamma)


def cam(feat, gamma, *, max_hw=2048):
    B, HW, C = feat.shape
    THW = _pick_tile(HW, max_hw)
    n = HW // THW
    fspec = pl.BlockSpec((1, THW, C), lambda b, t: (b, t, 0))
    attn = pl.pallas_call(
        cam_attn_kernel,
        out_shape=jax.ShapeDtypeStruct((B, C, C), BF16),
        grid=(B, n),
        in_specs=[fspec],
        out_specs=pl.BlockSpec((1, C, C), lambda b, t: (b, 0, 0)),
        scratch_shapes=[pltpu.VMEM((C, C), F32)],
        compiler_params=pltpu.CompilerParams(
            dimension_semantics=("parallel", "arbitrary"),
            vmem_limit_bytes=VMEM_LIMIT),
    )(feat)
    return pl.pallas_call(
        cam_apply_kernel,
        out_shape=jax.ShapeDtypeStruct((B, HW, C), BF16),
        grid=(B, n),
        in_specs=[fspec,
                  pl.BlockSpec((1, C, C), lambda b, t: (b, 0, 0)),
                  pl.BlockSpec((1, 1), lambda b, t: (0, 0))],
        out_specs=fspec,
        compiler_params=pltpu.CompilerParams(
            dimension_semantics=("parallel", "parallel"),
            vmem_limit_bytes=VMEM_LIMIT),
    )(feat, attn, gamma)


def tail_fused(sa_feat, sc_feat, H, W, w51, s51, sh51, w52, s52, sh52, w8, b8,
               *, max_tile_px=2048):
    B, HW, C = sa_feat.shape
    C2 = w51.shape[-1]
    Cout = w8.shape[-1]
    Coutp = _round_up(Cout, 128)      # lane-dense 1x1 output, sliced below
    TH = _pick_row_tile(H, W, max_tile_px)
    nR = H // TH
    sa_p = jnp.pad(sa_feat.reshape(B, H, W, C), ((0, 0), (1, 1), (1, 1), (0, 0)))
    sc_p = jnp.pad(sc_feat.reshape(B, H, W, C), ((0, 0), (1, 1), (1, 1), (0, 0)))
    w8_p = jnp.zeros((C2, Coutp), F32).at[:, :Cout].set(w8).astype(BF16)
    b8_p = jnp.zeros((1, Coutp), F32).at[:, :Cout].set(b8)
    kern = functools.partial(tail_kernel, TH=TH, W=W, C=C)
    slab = pl.BlockSpec((1, H + 2, W + 2, C), lambda b, r: (b, 0, 0, 0))
    wspec = pl.BlockSpec((3, 3, C, C2), lambda b, r: (0, 0, 0, 0))
    vspec = pl.BlockSpec((1, C2), lambda b, r: (0, 0))
    feat_sum, sasc_p = pl.pallas_call(
        kern,
        out_shape=(jax.ShapeDtypeStruct((B, HW, C2), F32),
                   jax.ShapeDtypeStruct((B, HW, Coutp), F32)),
        grid=(B, nR),
        in_specs=[
            slab, slab,
            wspec, vspec, vspec,
            wspec, vspec, vspec,
            pl.BlockSpec((C2, Coutp), lambda b, r: (0, 0)),
            pl.BlockSpec((1, Coutp), lambda b, r: (0, 0)),
        ],
        out_specs=(pl.BlockSpec((1, TH * W, C2), lambda b, r: (b, r, 0)),
                   pl.BlockSpec((1, TH * W, Coutp), lambda b, r: (b, r, 0))),
        compiler_params=pltpu.CompilerParams(
            dimension_semantics=("parallel", "parallel"),
            vmem_limit_bytes=VMEM_LIMIT),
    )(sa_p, sc_p, w51.astype(BF16), s51, sh51, w52.astype(BF16), s52, sh52,
      w8_p, b8_p)
    return feat_sum, sasc_p[:, :, :Cout]


# ----------------------------------------------------------------------------
# Full DANetHead forward (Pallas pipeline) + matching pure-JAX reference
# ----------------------------------------------------------------------------

def danet_head_forward(x_nchw, p, *, conv_tile_px=2048, attn_q_tile=512,
                       attn_kv_tile=512, cam_hw_tile=2048):
    B, _, H, W = x_nchw.shape
    x = jnp.transpose(x_nchw, (0, 2, 3, 1))                  # NHWC f32
    feat1, feat2 = head_convs(x, p['w5a'], p['s5a'], p['sh5a'],
                              p['w5c'], p['s5c'], p['sh5c'],
                              max_tile_px=conv_tile_px)      # bf16 (B,HW,C)
    sa_feat = pam(feat1, p['wq'], p['bq'], p['wk'], p['bk'], p['wv'], p['bv'],
                  p['g_pam'], max_q=attn_q_tile, max_kv=attn_kv_tile)
    sc_feat = cam(feat2, p['g_cam'], max_hw=cam_hw_tile)
    feat_sum, sasc = tail_fused(sa_feat, sc_feat, H, W,
                                p['w51'], p['s51'], p['sh51'],
                                p['w52'], p['s52'], p['sh52'],
                                p['w8'], p['b8'], max_tile_px=conv_tile_px)
    C2 = feat_sum.shape[-1]
    Cout = sasc.shape[-1]
    feat_sum_nchw = jnp.transpose(feat_sum.reshape(B, H, W, C2), (0, 3, 1, 2))
    sasc_nchw = jnp.transpose(sasc.reshape(B, H, W, Cout), (0, 3, 1, 2))
    return feat_sum_nchw, sasc_nchw


def ref_forward(x_nchw, p):
    """Pure-JAX reference mirroring the kernel's bf16-matmul / f32-accumulate
    numerics, so tolerances can stay tight."""
    x = jnp.transpose(x_nchw, (0, 2, 3, 1))
    B, H, W, _ = x.shape

    def cbr(inp_bf, w, scale, shift):
        y = lax.conv_general_dilated(
            inp_bf, w.astype(BF16), (1, 1), 'SAME',
            dimension_numbers=('NHWC', 'HWIO', 'NHWC'),
            preferred_element_type=F32)
        return jnp.maximum(y * scale.reshape(1, 1, 1, -1)
                           + shift.reshape(1, 1, 1, -1), 0.0)

    feat1 = cbr(x.astype(BF16), p['w5a'], p['s5a'], p['sh5a'])
    feat2 = cbr(x.astype(BF16), p['w5c'], p['s5c'], p['sh5c'])
    C = feat1.shape[-1]
    f1 = feat1.reshape(B, H * W, C).astype(BF16)
    f2 = feat2.reshape(B, H * W, C).astype(BF16)

    def proj(f, w, b):
        return jnp.einsum('bpc,cd->bpd', f, w.astype(BF16),
                          preferred_element_type=F32) + b

    # PAM
    q = proj(f1, p['wq'], p['bq'])
    k = proj(f1, p['wk'], p['bk'])
    v = proj(f1, p['wv'], p['bv'])
    energy = jnp.einsum('bic,bjc->bij', q.astype(BF16), k.astype(BF16),
                        preferred_element_type=F32)
    attn = jax.nn.softmax(energy, axis=-1)
    pam_out = jnp.einsum('bij,bjc->bic', attn.astype(BF16), v.astype(BF16),
                         preferred_element_type=F32)
    sa = (p['g_pam'][0, 0] * pam_out + f1.astype(F32)).astype(BF16)

    # CAM
    gram = jnp.einsum('bpi,bpj->bij', f2, f2, preferred_element_type=F32)
    e_new = jnp.max(gram, axis=-1, keepdims=True) - gram
    attn2 = jax.nn.softmax(e_new, axis=-1).astype(BF16)
    cam_out = jnp.einsum('bcd,bpd->bpc', attn2, f2, preferred_element_type=F32)
    sc = (p['g_cam'][0, 0] * cam_out + f2.astype(F32)).astype(BF16)

    sa_conv = cbr(sa.reshape(B, H, W, C), p['w51'], p['s51'], p['sh51'])
    sc_conv = cbr(sc.reshape(B, H, W, C), p['w52'], p['s52'], p['sh52'])
    feat_sum = sa_conv + sc_conv                             # (B,H,W,C2) f32
    sasc = (jnp.einsum('bhwc,cd->bhwd', feat_sum.astype(BF16),
                       p['w8'].astype(BF16), preferred_element_type=F32)
            + p['b8'].reshape(1, 1, 1, -1))
    return (jnp.transpose(feat_sum, (0, 3, 1, 2)),
            jnp.transpose(sasc, (0, 3, 1, 2)))


# ----------------------------------------------------------------------------
# Deterministic parameter construction
# ----------------------------------------------------------------------------

def make_params(key, in_channels, out_channels, DADiv1, DADiv2):
    inter = in_channels // int(DADiv1)
    inter2 = inter // int(DADiv2)
    c8 = inter // 8 if inter >= 8 else 1
    ks = jax.random.split(key, 16)

    def conv_w(k, cin, cout):
        return jax.random.normal(k, (3, 3, cin, cout), F32) * 0.1

    def bn_fold(k, c):
        k1, k2, k3, k4 = jax.random.split(k, 4)
        g = 1.0 + 0.1 * jax.random.normal(k1, (1, c), F32)
        b = 0.1 * jax.random.normal(k2, (1, c), F32)
        mean = 0.1 * jax.random.normal(k3, (1, c), F32)
        var = 1.0 + 0.1 * jnp.abs(jax.random.normal(k4, (1, c), F32))
        scale = g / jnp.sqrt(var + 1e-5)
        shift = b - mean * scale
        return scale, shift

    s5a, sh5a = bn_fold(ks[1], inter)
    s5c, sh5c = bn_fold(ks[3], inter)
    s51, sh51 = bn_fold(ks[5], inter2)
    s52, sh52 = bn_fold(ks[7], inter2)

    return dict(
        w5a=conv_w(ks[0], in_channels, inter), s5a=s5a, sh5a=sh5a,
        w5c=conv_w(ks[2], in_channels, inter), s5c=s5c, sh5c=sh5c,
        w51=conv_w(ks[4], inter, inter2), s51=s51, sh51=sh51,
        w52=conv_w(ks[6], inter, inter2), s52=s52, sh52=sh52,
        wq=jax.random.normal(ks[8], (inter, c8), F32) * 0.1,
        bq=jax.random.normal(ks[9], (1, c8), F32) * 0.1,
        wk=jax.random.normal(ks[10], (inter, c8), F32) * 0.1,
        bk=jax.random.normal(ks[11], (1, c8), F32) * 0.1,
        wv=jax.random.normal(ks[12], (inter, inter), F32) * 0.1,
        bv=jax.random.normal(ks[13], (1, inter), F32) * 0.1,
        w8=jax.random.normal(ks[14], (inter2, out_channels), F32) * 0.1,
        b8=jax.random.normal(ks[15], (1, out_channels), F32) * 0.1,
        # PyTorch inits these to 0; nonzero here so the attention path matters.
        g_pam=jnp.full((1, 1), 0.5, F32),
        g_cam=jnp.full((1, 1), 0.3, F32),
    )


if __name__ == "__main__":
    B, Cin, H, W = 2, 32, 8, 8
    out_channels, DADiv1, DADiv2 = 4, 2, 2

    key = jax.random.PRNGKey(0)
    kx, kp = jax.random.split(key)
    x = jax.random.normal(kx, (B, Cin, H, W), F32)
    params = make_params(kp, Cin, out_channels, DADiv1, DADiv2)

    # Small tile limits so row / q / kv / hw tiling and the multi-step online
    # softmax path are exercised even at this toy resolution.
    feat_sum, sasc_output = danet_head_forward(
        x, params, conv_tile_px=32, attn_q_tile=32, attn_kv_tile=32,
        cam_hw_tile=32)
    feat_sum = jax.block_until_ready(feat_sum)
    sasc_output = jax.block_until_ready(sasc_output)

    ref_sum, ref_out = ref_forward(x, params)
    assert feat_sum.shape == (B, Cin // DADiv1 // DADiv2, H, W)
    assert sasc_output.shape == (B, out_channels, H, W)
    assert jnp.allclose(feat_sum, ref_sum, atol=1e-2, rtol=1e-2), (
        float(jnp.max(jnp.abs(feat_sum - ref_sum))))
    assert jnp.allclose(sasc_output, ref_out, atol=1e-2, rtol=1e-2), (
        float(jnp.max(jnp.abs(sasc_output - ref_out))))

    print("KERNEL_OK")
</pallas_src>

<mosaic_0001>
module attributes {stable_mosaic.version = 11 : i64} {
  func.func @head_conv_kernel(%arg0: i32, %arg1: i32, %arg2: memref<1x10x10x32xbf16, #tpu.memory_space<vmem>>, %arg3: memref<3x3x32x16xbf16, #tpu.memory_space<vmem>>, %arg4: memref<1x16xf32, #tpu.memory_space<vmem>>, %arg5: memref<1x16xf32, #tpu.memory_space<vmem>>, %arg6: memref<3x3x32x16xbf16, #tpu.memory_space<vmem>>, %arg7: memref<1x16xf32, #tpu.memory_space<vmem>>, %arg8: memref<1x16xf32, #tpu.memory_space<vmem>>, %arg9: memref<1x32x16xbf16, #tpu.memory_space<vmem>>, %arg10: memref<1x32x16xbf16, #tpu.memory_space<vmem>>) attributes {dimension_semantics = [#tpu.dimension_semantics<parallel>, #tpu.dimension_semantics<parallel>], iteration_bounds = array<i64: 2, 2>, scalar_prefetch = 0 : i64, scratch_operands = 0 : i64, tpu.core_type = #tpu.core_type<tc>, window_params = [{transform_indices = @transform_0, window_bounds = array<i64: 1, 10, 10, 32>}, {pipeline_mode = #tpu.pipeline_mode<synchronous>, transform_indices = @transform_1, window_bounds = array<i64: 3, 3, 32, 16>}, {pipeline_mode = #tpu.pipeline_mode<synchronous>, transform_indices = @transform_2, window_bounds = array<i64: 1, 16>}, {pipeline_mode = #tpu.pipeline_mode<synchronous>, transform_indices = @transform_3, window_bounds = array<i64: 1, 16>}, {pipeline_mode = #tpu.pipeline_mode<synchronous>, transform_indices = @transform_4, window_bounds = array<i64: 3, 3, 32, 16>}, {pipeline_mode = #tpu.pipeline_mode<synchronous>, transform_indices = @transform_5, window_bounds = array<i64: 1, 16>}, {pipeline_mode = #tpu.pipeline_mode<synchronous>, transform_indices = @transform_6, window_bounds = array<i64: 1, 16>}, {transform_indices = @transform_7, window_bounds = array<i64: 1, 32, 16>}, {transform_indices = @transform_8, window_bounds = array<i64: 1, 32, 16>}]} {
    %c4_i32 = arith.constant 4 : i32
    %0 = arith.muli %arg1, %c4_i32 : i32
    %1 = tpu.assume_multiple %0, 4 : i32
    %c0 = arith.constant 0 : index
    %2 = arith.index_cast %1 : i32 to index
    %c0_0 = arith.constant 0 : index
    %c0_1 = arith.constant 0 : index
    %3 = vector.load %arg2[%c0, %2, %c0_0, %c0_1] : memref<1x10x10x32xbf16, #tpu.memory_space<vmem>>, vector<1x6x10x32xbf16>
    %4 = vector.shape_cast %3 : vector<1x6x10x32xbf16> to vector<6x10x32xbf16>
    %cst = arith.constant 0.000000e+00 : f32
    %5 = vector.broadcast %cst : f32 to vector<32x16xf32>
    %cst_2 = arith.constant 0.000000e+00 : f32
    %6 = vector.broadcast %cst_2 : f32 to vector<32x16xf32>
    %7 = vector.extract_strided_slice %4 {offsets = [0, 0, 0], sizes = [4, 8, 32], strides = [1, 1, 1]} : vector<6x10x32xbf16> to vector<4x8x32xbf16>
    %8 = vector.shape_cast %7 : vector<4x8x32xbf16> to vector<32x32xbf16>
    %c0_3 = arith.constant 0 : index
    %c0_4 = arith.constant 0 : index
    %c0_5 = arith.constant 0 : index
    %c0_6 = arith.constant 0 : index
    %9 = vector.load %arg3[%c0_3, %c0_4, %c0_5, %c0_6] : memref<3x3x32x16xbf16, #tpu.memory_space<vmem>>, vector<1x1x32x16xbf16>
    %10 = vector.shape_cast %9 : vector<1x1x32x16xbf16> to vector<32x16xbf16>
    %cst_7 = arith.constant dense<0.000000e+00> : vector<32x16xf32>
    %11 = tpu.matmul %8, %10, %cst_7 {dimension_numbers = #tpu.dot_dimension_numbers<[1], [0], [0], [1], [0, 0, 1, 1], [], []>} : vector<32x32xbf16>, vector<32x16xbf16>, vector<32x16xf32> -> vector<32x16xf32>
    %12 = arith.addf %5, %11 : vector<32x16xf32>
    %c0_8 = arith.constant 0 : index
    %c0_9 = arith.constant 0 : index
    %c0_10 = arith.constant 0 : index
    %c0_11 = arith.constant 0 : index
    %13 = vector.load %arg6[%c0_8, %c0_9, %c0_10, %c0_11] : memref<3x3x32x16xbf16, #tpu.memory_space<vmem>>, vector<1x1x32x16xbf16>
    %14 = vector.shape_cast %13 : vector<1x1x32x16xbf16> to vector<32x16xbf16>
    %cst_12 = arith.constant dense<0.000000e+00> : vector<32x16xf32>
    %15 = tpu.matmul %8, %14, %cst_12 {dimension_numbers = #tpu.dot_dimension_numbers<[1], [0], [0], [1], [0, 0, 1, 1], [], []>} : vector<32x32xbf16>, vector<32x16xbf16>, vector<32x16xf32> -> vector<32x16xf32>
    %16 = arith.addf %6, %15 : vector<32x16xf32>
    %17 = vector.extract_strided_slice %4 {offsets = [0, 1, 0], sizes = [4, 8, 32], strides = [1, 1, 1]} : vector<6x10x32xbf16> to vector<4x8x32xbf16>
    %18 = vector.shape_cast %17 : vector<4x8x32xbf16> to vector<32x32xbf16>
    %c0_13 = arith.constant 0 : index
    %c1 = arith.constant 1 : index
    %c0_14 = arith.constant 0 : index
    %c0_15 = arith.constant 0 : index
    %19 = vector.load %arg3[%c0_13, %c1, %c0_14, %c0_15] : memref<3x3x32x16xbf16, #tpu.memory_space<vmem>>, vector<1x1x32x16xbf16>
    %20 = vector.shape_cast %19 : vector<1x1x32x16xbf16> to vector<32x16xbf16>
    %cst_16 = arith.constant dense<0.000000e+00> : vector<32x16xf32>
    %21 = tpu.matmul %18, %20, %cst_16 {dimension_numbers = #tpu.dot_dimension_numbers<[1], [0], [0], [1], [0, 0, 1, 1], [], []>} : vector<32x32xbf16>, vector<32x16xbf16>, vector<32x16xf32> -> vector<32x16xf32>
    %22 = arith.addf %12, %21 : vector<32x16xf32>
    %c0_17 = arith.constant 0 : index
    %c1_18 = arith.constant 1 : index
    %c0_19 = arith.constant 0 : index
    %c0_20 = arith.constant 0 : index
    %23 = vector.load %arg6[%c0_17, %c1_18, %c0_19, %c0_20] : memref<3x3x32x16xbf16, #tpu.memory_space<vmem>>, vector<1x1x32x16xbf16>
    %24 = vector.shape_cast %23 : vector<1x1x32x16xbf16> to vector<32x16xbf16>
    %cst_21 = arith.constant dense<0.000000e+00> : vector<32x16xf32>
    %25 = tpu.matmul %18, %24, %cst_21 {dimension_numbers = #tpu.dot_dimension_numbers<[1], [0], [0], [1], [0, 0, 1, 1], [], []>} : vector<32x32xbf16>, vector<32x16xbf16>, vector<32x16xf32> -> vector<32x16xf32>
    %26 = arith.addf %16, %25 : vector<32x16xf32>
    %27 = vector.extract_strided_slice %4 {offsets = [0, 2, 0], sizes = [4, 8, 32], strides = [1, 1, 1]} : vector<6x10x32xbf16> to vector<4x8x32xbf16>
    %28 = vector.shape_cast %27 : vector<4x8x32xbf16> to vector<32x32xbf16>
    %c0_22 = arith.constant 0 : index
    %c2 = arith.constant 2 : index
    %c0_23 = arith.constant 0 : index
    %c0_24 = arith.constant 0 : index
    %29 = vector.load %arg3[%c0_22, %c2, %c0_23, %c0_24] : memref<3x3x32x16xbf16, #tpu.memory_space<vmem>>, vector<1x1x32x16xbf16>
    %30 = vector.shape_cast %29 : vector<1x1x32x16xbf16> to vector<32x16xbf16>
    %cst_25 = arith.constant dense<0.000000e+00> : vector<32x16xf32>
    %31 = tpu.matmul %28, %30, %cst_25 {dimension_numbers = #tpu.dot_dimension_numbers<[1], [0], [0], [1], [0, 0, 1, 1], [], []>} : vector<32x32xbf16>, vector<32x16xbf16>, vector<32x16xf32> -> vector<32x16xf32>
    %32 = arith.addf %22, %31 : vector<32x16xf32>
    %c0_26 = arith.constant 0 : index
    %c2_27 = arith.constant 2 : index
    %c0_28 = arith.constant 0 : index
    %c0_29 = arith.constant 0 : index
    %33 = vector.load %arg6[%c0_26, %c2_27, %c0_28, %c0_29] : memref<3x3x32x16xbf16, #tpu.memory_space<vmem>>, vector<1x1x32x16xbf16>
    %34 = vector.shape_cast %33 : vector<1x1x32x16xbf16> to vector<32x16xbf16>
    %cst_30 = arith.constant dense<0.000000e+00> : vector<32x16xf32>
    %35 = tpu.matmul %28, %34, %cst_30 {dimension_numbers = #tpu.dot_dimension_numbers<[1], [0], [0], [1], [0, 0, 1, 1], [], []>} : vector<32x32xbf16>, vector<32x16xbf16>, vector<32x16xf32> -> vector<32x16xf32>
    %36 = arith.addf %26, %35 : vector<32x16xf32>
    %37 = vector.extract_strided_slice %4 {offsets = [1, 0, 0], sizes = [4, 8, 32], strides = [1, 1, 1]} : vector<6x10x32xbf16> to vector<4x8x32xbf16>
    %38 = vector.shape_cast %37 : vector<4x8x32xbf16> to vector<32x32xbf16>
    %c1_31 = arith.constant 1 : index
    %c0_32 = arith.constant 0 : index
    %c0_33 = arith.constant 0 : index
    %c0_34 = arith.constant 0 : index
    %39 = vector.load %arg3[%c1_31, %c0_32, %c0_33, %c0_34] : memref<3x3x32x16xbf16, #tpu.memory_space<vmem>>, vector<1x1x32x16xbf16>
    %40 = vector.shape_cast %39 : vector<1x1x32x16xbf16> to vector<32x16xbf16>
    %cst_35 = arith.constant dense<0.000000e+00> : vector<32x16xf32>
    %41 = tpu.matmul %38, %40, %cst_35 {dimension_numbers = #tpu.dot_dimension_numbers<[1], [0], [0], [1], [0, 0, 1, 1], [], []>} : vector<32x32xbf16>, vector<32x16xbf16>, vector<32x16xf32> -> vector<32x16xf32>
    %42 = arith.addf %32, %41 : vector<32x16xf32>
    %c1_36 = arith.constant 1 : index
    %c0_37 = arith.constant 0 : index
    %c0_38 = arith.constant 0 : index
    %c0_39 = arith.constant 0 : index
    %43 = vector.load %arg6[%c1_36, %c0_37, %c0_38, %c0_39] : memref<3x3x32x16xbf16, #tpu.memory_space<vmem>>, vector<1x1x32x16xbf16>
    %44 = vector.shape_cast %43 : vector<1x1x32x16xbf16> to vector<32x16xbf16>
    %cst_40 = arith.constant dense<0.000000e+00> : vector<32x16xf32>
    %45 = tpu.matmul %38, %44, %cst_40 {dimension_numbers = #tpu.dot_dimension_numbers<[1], [0], [0], [1], [0, 0, 1, 1], [], []>} : vector<32x32xbf16>, vector<32x16xbf16>, vector<32x16xf32> -> vector<32x16xf32>
    %46 = arith.addf %36, %45 : vector<32x16xf32>
    %47 = vector.extract_strided_slice %4 {offsets = [1, 1, 0], sizes = [4, 8, 32], strides = [1, 1, 1]} : vector<6x10x32xbf16> to vector<4x8x32xbf16>
    %48 = vector.shape_cast %47 : vector<4x8x32xbf16> to vector<32x32xbf16>
    %c1_41 = arith.constant 1 : index
    %c1_42 = arith.constant 1 : index
    %c0_43 = arith.constant 0 : index
    %c0_44 = arith.constant 0 : index
    %49 = vector.load %arg3[%c1_41, %c1_42, %c0_43, %c0_44] : memref<3x3x32x16xbf16, #tpu.memory_space<vmem>>, vector<1x1x32x16xbf16>
    %50 = vector.shape_cast %49 : vector<1x1x32x16xbf16> to vector<32x16xbf16>
    %cst_45 = arith.constant dense<0.000000e+00> : vector<32x16xf32>
    %51 = tpu.matmul %48, %50, %cst_45 {dimension_numbers = #tpu.dot_dimension_numbers<[1], [0], [0], [1], [0, 0, 1, 1], [], []>} : vector<32x32xbf16>, vector<32x16xbf16>, vector<32x16xf32> -> vector<32x16xf32>
    %52 = arith.addf %42, %51 : vector<32x16xf32>
    %c1_46 = arith.constant 1 : index
    %c1_47 = arith.constant 1 : index
    %c0_48 = arith.constant 0 : index
    %c0_49 = arith.constant 0 : index
    %53 = vector.load %arg6[%c1_46, %c1_47, %c0_48, %c0_49] : memref<3x3x32x16xbf16, #tpu.memory_space<vmem>>, vector<1x1x32x16xbf16>
    %54 = vector.shape_cast %53 : vector<1x1x32x16xbf16> to vector<32x16xbf16>
    %cst_50 = arith.constant dense<0.000000e+00> : vector<32x16xf32>
    %55 = tpu.matmul %48, %54, %cst_50 {dimension_numbers = #tpu.dot_dimension_numbers<[1], [0], [0], [1], [0, 0, 1, 1], [], []>} : vector<32x32xbf16>, vector<32x16xbf16>, vector<32x16xf32> -> vector<32x16xf32>
    %56 = arith.addf %46, %55 : vector<32x16xf32>
    %57 = vector.extract_strided_slice %4 {offsets = [1, 2, 0], sizes = [4, 8, 32], strides = [1, 1, 1]} : vector<6x10x32xbf16> to vector<4x8x32xbf16>
    %58 = vector.shape_cast %57 : vector<4x8x32xbf16> to vector<32x32xbf16>
    %c1_51 = arith.constant 1 : index
    %c2_52 = arith.constant 2 : index
    %c0_53 = arith.constant 0 : index
    %c0_54 = arith.constant 0 : index
    %59 = vector.load %arg3[%c1_51, %c2_52, %c0_53, %c0_54] : memref<3x3x32x16xbf16, #tpu.memory_space<vmem>>, vector<1x1x32x16xbf16>
    %60 = vector.shape_cast %59 : vector<1x1x32x16xbf16> to vector<32x16xbf16>
    %cst_55 = arith.constant dense<0.000000e+00> : vector<32x16xf32>
    %61 = tpu.matmul %58, %60, %cst_55 {dimension_numbers = #tpu.dot_dimension_numbers<[1], [0], [0], [1], [0, 0, 1, 1], [], []>} : vector<32x32xbf16>, vector<32x16xbf16>, vector<32x16xf32> -> vector<32x16xf32>
    %62 = arith.addf %52, %61 : vector<32x16xf32>
    %c1_56 = arith.constant 1 : index
    %c2_57 = arith.constant 2 : index
    %c0_58 = arith.constant 0 : index
    %c0_59 = arith.constant 0 : index
    %63 = vector.load %arg6[%c1_56, %c2_57, %c0_58, %c0_59] : memref<3x3x32x16xbf16, #tpu.memory_space<vmem>>, vector<1x1x32x16xbf16>
    %64 = vector.shape_cast %63 : vector<1x1x32x16xbf16> to vector<32x16xbf16>
    %cst_60 = arith.constant dense<0.000000e+00> : vector<32x16xf32>
    %65 = tpu.matmul %58, %64, %cst_60 {dimension_numbers = #tpu.dot_dimension_numbers<[1], [0], [0], [1], [0, 0, 1, 1], [], []>} : vector<32x32xbf16>, vector<32x16xbf16>, vector<32x16xf32> -> vector<32x16xf32>
    %66 = arith.addf %56, %65 : vector<32x16xf32>
    %67 = vector.extract_strided_slice %4 {offsets = [2, 0, 0], sizes = [4, 8, 32], strides = [1, 1, 1]} : vector<6x10x32xbf16> to vector<4x8x32xbf16>
    %68 = vector.shape_cast %67 : vector<4x8x32xbf16> to vector<32x32xbf16>
    %c2_61 = arith.constant 2 : index
    %c0_62 = arith.constant 0 : index
    %c0_63 = arith.constant 0 : index
    %c0_64 = arith.constant 0 : index
    %69 = vector.load %arg3[%c2_61, %c0_62, %c0_63, %c0_64] : memref<3x3x32x16xbf16, #tpu.memory_space<vmem>>, vector<1x1x32x16xbf16>
    %70 = vector.shape_cast %69 : vector<1x1x32x16xbf16> to vector<32x16xbf16>
    %cst_65 = arith.constant dense<0.000000e+00> : vector<32x16xf32>
    %71 = tpu.matmul %68, %70, %cst_65 {dimension_numbers = #tpu.dot_dimension_numbers<[1], [0], [0], [1], [0, 0, 1, 1], [], []>} : vector<32x32xbf16>, vector<32x16xbf16>, vector<32x16xf32> -> vector<32x16xf32>
    %72 = arith.addf %62, %71 : vector<32x16xf32>
    %c2_66 = arith.constant 2 : index
    %c0_67 = arith.constant 0 : index
    %c0_68 = arith.constant 0 : index
    %c0_69 = arith.constant 0 : index
    %73 = vector.load %arg6[%c2_66, %c0_67, %c0_68, %c0_69] : memref<3x3x32x16xbf16, #tpu.memory_space<vmem>>, vector<1x1x32x16xbf16>
    %74 = vector.shape_cast %73 : vector<1x1x32x16xbf16> to vector<32x16xbf16>
    %cst_70 = arith.constant dense<0.000000e+00> : vector<32x16xf32>
    %75 = tpu.matmul %68, %74, %cst_70 {dimension_numbers = #tpu.dot_dimension_numbers<[1], [0], [0], [1], [0, 0, 1, 1], [], []>} : vector<32x32xbf16>, vector<32x16xbf16>, vector<32x16xf32> -> vector<32x16xf32>
    %76 = arith.addf %66, %75 : vector<32x16xf32>
    %77 = vector.extract_strided_slice %4 {offsets = [2, 1, 0], sizes = [4, 8, 32], strides = [1, 1, 1]} : vector<6x10x32xbf16> to vector<4x8x32xbf16>
    %78 = vector.shape_cast %77 : vector<4x8x32xbf16> to vector<32x32xbf16>
    %c2_71 = arith.constant 2 : index
    %c1_72 = arith.constant 1 : index
    %c0_73 = arith.constant 0 : index
    %c0_74 = arith.constant 0 : index
    %79 = vector.load %arg3[%c2_71, %c1_72, %c0_73, %c0_74] : memref<3x3x32x16xbf16, #tpu.memory_space<vmem>>, vector<1x1x32x16xbf16>
    %80 = vector.shape_cast %79 : vector<1x1x32x16xbf16> to vector<32x16xbf16>
    %cst_75 = arith.constant dense<0.000000e+00> : vector<32x16xf32>
    %81 = tpu.matmul %78, %80, %cst_75 {dimension_numbers = #tpu.dot_dimension_numbers<[1], [0], [0], [1], [0, 0, 1, 1], [], []>} : vector<32x32xbf16>, vector<32x16xbf16>, vector<32x16xf32> -> vector<32x16xf32>
    %82 = arith.addf %72, %81 : vector<32x16xf32>
    %c2_76 = arith.constant 2 : index
    %c1_77 = arith.constant 1 : index
    %c0_78 = arith.constant 0 : index
    %c0_79 = arith.constant 0 : index
    %83 = vector.load %arg6[%c2_76, %c1_77, %c0_78, %c0_79] : memref<3x3x32x16xbf16, #tpu.memory_space<vmem>>, vector<1x1x32x16xbf16>
    %84 = vector.shape_cast %83 : vector<1x1x32x16xbf16> to vector<32x16xbf16>
    %cst_80 = arith.constant dense<0.000000e+00> : vector<32x16xf32>
    %85 = tpu.matmul %78, %84, %cst_80 {dimension_numbers = #tpu.dot_dimension_numbers<[1], [0], [0], [1], [0, 0, 1, 1], [], []>} : vector<32x32xbf16>, vector<32x16xbf16>, vector<32x16xf32> -> vector<32x16xf32>
    %86 = arith.addf %76, %85 : vector<32x16xf32>
    %87 = vector.extract_strided_slice %4 {offsets = [2, 2, 0], sizes = [4, 8, 32], strides = [1, 1, 1]} : vector<6x10x32xbf16> to vector<4x8x32xbf16>
    %88 = vector.shape_cast %87 : vector<4x8x32xbf16> to vector<32x32xbf16>
    %c2_81 = arith.constant 2 : index
    %c2_82 = arith.constant 2 : index
    %c0_83 = arith.constant 0 : index
    %c0_84 = arith.constant 0 : index
    %89 = vector.load %arg3[%c2_81, %c2_82, %c0_83, %c0_84] : memref<3x3x32x16xbf16, #tpu.memory_space<vmem>>, vector<1x1x32x16xbf16>
    %90 = vector.shape_cast %89 : vector<1x1x32x16xbf16> to vector<32x16xbf16>
    %cst_85 = arith.constant dense<0.000000e+00> : vector<32x16xf32>
    %91 = tpu.matmul %88, %90, %cst_85 {dimension_numbers = #tpu.dot_dimension_numbers<[1], [0], [0], [1], [0, 0, 1, 1], [], []>} : vector<32x32xbf16>, vector<32x16xbf16>, vector<32x16xf32> -> vector<32x16xf32>
    %92 = arith.addf %82, %91 : vector<32x16xf32>
    %c2_86 = arith.constant 2 : index
    %c2_87 = arith.constant 2 : index
    %c0_88 = arith.constant 0 : index
    %c0_89 = arith.constant 0 : index
    %93 = vector.load %arg6[%c2_86, %c2_87, %c0_88, %c0_89] : memref<3x3x32x16xbf16, #tpu.memory_space<vmem>>, vector<1x1x32x16xbf16>
    %94 = vector.shape_cast %93 : vector<1x1x32x16xbf16> to vector<32x16xbf16>
    %cst_90 = arith.constant dense<0.000000e+00> : vector<32x16xf32>
    %95 = tpu.matmul %88, %94, %cst_90 {dimension_numbers = #tpu.dot_dimension_numbers<[1], [0], [0], [1], [0, 0, 1, 1], [], []>} : vector<32x32xbf16>, vector<32x16xbf16>, vector<32x16xf32> -> vector<32x16xf32>
    %96 = arith.addf %86, %95 : vector<32x16xf32>
    %c0_91 = arith.constant 0 : index
    %c0_92 = arith.constant 0 : index
    %97 = vector.load %arg4[%c0_91, %c0_92] : memref<1x16xf32, #tpu.memory_space<vmem>>, vector<1x16xf32>
    %98 = vector.shape_cast %97 : vector<1x16xf32> to vector<16xf32>
    %99 = vector.shape_cast %98 : vector<16xf32> to vector<1x16xf32>
    %100 = vector.broadcast %99 : vector<1x16xf32> to vector<32x16xf32>
    %101 = arith.mulf %92, %100 : vector<32x16xf32>
    %c0_93 = arith.constant 0 : index
    %c0_94 = arith.constant 0 : index
    %102 = vector.load %arg5[%c0_93, %c0_94] : memref<1x16xf32, #tpu.memory_space<vmem>>, vector<1x16xf32>
    %103 = vector.shape_cast %102 : vector<1x16xf32> to vector<16xf32>
    %104 = vector.shape_cast %103 : vector<16xf32> to vector<1x16xf32>
    %105 = vector.broadcast %104 : vector<1x16xf32> to vector<32x16xf32>
    %106 = arith.addf %101, %105 : vector<32x16xf32>
    %cst_95 = arith.constant 0.000000e+00 : f32
    %107 = vector.broadcast %cst_95 : f32 to vector<32x16xf32>
    %108 = arith.maximumf %106, %107 : vector<32x16xf32>
    %109 = arith.truncf %108 : vector<32x16xf32> to vector<32x16xbf16>
    %c0_96 = arith.constant 0 : index
    %c0_97 = arith.constant 0 : index
    %c0_98 = arith.constant 0 : index
    %110 = vector.load %arg9[%c0_96, %c0_97, %c0_98] : memref<1x32x16xbf16, #tpu.memory_space<vmem>>, vector<1x32x16xbf16>
    %111 = vector.shape_cast %110 : vector<1x32x16xbf16> to vector<32x16xbf16>
    %112 = vector.shape_cast %109 : vector<32x16xbf16> to vector<1x32x16xbf16>
    tpu.vector_store %arg9[%c0_96, %c0_97, %c0_98], %112 {strides = array<i32>} : memref<1x32x16xbf16, #tpu.memory_space<vmem>>, vector<1x32x16xbf16>,
    %c0_99 = arith.constant 0 : index
    %c0_100 = arith.constant 0 : index
    %113 = vector.load %arg7[%c0_99, %c0_100] : memref<1x16xf32, #tpu.memory_space<vmem>>, vector<1x16xf32>
    %114 = vector.shape_cast %113 : vector<1x16xf32> to vector<16xf32>
    %115 = vector.shape_cast %114 : vector<16xf32> to vector<1x16xf32>
    %116 = vector.broadcast %115 : vector<1x16xf32> to vector<32x16xf32>
    %117 = arith.mulf %96, %116 : vector<32x16xf32>
    %c0_101 = arith.constant 0 : index
    %c0_102 = arith.constant 0 : index
    %118 = vector.load %arg8[%c0_101, %c0_102] : memref<1x16xf32, #tpu.memory_space<vmem>>, vector<1x16xf32>
    %119 = vector.shape_cast %118 : vector<1x16xf32> to vector<16xf32>
    %120 = vector.shape_cast %119 : vector<16xf32> to vector<1x16xf32>
    %121 = vector.broadcast %120 : vector<1x16xf32> to vector<32x16xf32>
    %122 = arith.addf %117, %121 : vector<32x16xf32>
    %cst_103 = arith.constant 0.000000e+00 : f32
    %123 = vector.broadcast %cst_103 : f32 to vector<32x16xf32>
    %124 = arith.maximumf %122, %123 : vector<32x16xf32>
    %125 = arith.truncf %124 : vector<32x16xf32> to vector<32x16xbf16>
    %c0_104 = arith.constant 0 : index
    %c0_105 = arith.constant 0 : index
    %c0_106 = arith.constant 0 : index
    %126 = vector.load %arg10[%c0_104, %c0_105, %c0_106] : memref<1x32x16xbf16, #tpu.memory_space<vmem>>, vector<1x32x16xbf16>
    %127 = vector.shape_cast %126 : vector<1x32x16xbf16> to vector<32x16xbf16>
    %128 = vector.shape_cast %125 : vector<32x16xbf16> to vector<1x32x16xbf16>
    tpu.vector_store %arg10[%c0_104, %c0_105, %c0_106], %128 {strides = array<i32>} : memref<1x32x16xbf16, #tpu.memory_space<vmem>>, vector<1x32x16xbf16>,
    return
  }
  func.func @transform_0(%arg0: i32, %arg1: i32) -> (i32, i32, i32, i32) {
    %c0_i32 = arith.constant 0 : i32
    %c0_i32_0 = arith.constant 0 : i32
    %c0_i32_1 = arith.constant 0 : i32
    %c0_i32_2 = arith.constant 0 : i32
    return %arg0, %c0_i32, %c0_i32_0, %c0_i32_1 : i32, i32, i32, i32
  }
  func.func @transform_1(%arg0: i32, %arg1: i32) -> (i32, i32, i32, i32) {
    %c0_i32 = arith.constant 0 : i32
    %c0_i32_0 = arith.constant 0 : i32
    %c0_i32_1 = arith.constant 0 : i32
    %c0_i32_2 = arith.constant 0 : i32
    %c0_i32_3 = arith.constant 0 : i32
    return %c0_i32, %c0_i32_0, %c0_i32_1, %c0_i32_2 : i32, i32, i32, i32
  }
  func.func @transform_2(%arg0: i32, %arg1: i32) -> (i32, i32) {
    %c0_i32 = arith.constant 0 : i32
    %c0_i32_0 = arith.constant 0 : i32
    %c0_i32_1 = arith.constant 0 : i32
    return %c0_i32, %c0_i32_0 : i32, i32
  }
  func.func @transform_3(%arg0: i32, %arg1: i32) -> (i32, i32) {
    %c0_i32 = arith.constant 0 : i32
    %c0_i32_0 = arith.constant 0 : i32
    %c0_i32_1 = arith.constant 0 : i32
    return %c0_i32, %c0_i32_0 : i32, i32
  }
  func.func @transform_4(%arg0: i32, %arg1: i32) -> (i32, i32, i32, i32) {
    %c0_i32 = arith.constant 0 : i32
    %c0_i32_0 = arith.constant 0 : i32
    %c0_i32_1 = arith.constant 0 : i32
    %c0_i32_2 = arith.constant 0 : i32
    %c0_i32_3 = arith.constant 0 : i32
    return %c0_i32, %c0_i32_0, %c0_i32_1, %c0_i32_2 : i32, i32, i32, i32
  }
  func.func @transform_5(%arg0: i32, %arg1: i32) -> (i32, i32) {
    %c0_i32 = arith.constant 0 : i32
    %c0_i32_0 = arith.constant 0 : i32
    %c0_i32_1 = arith.constant 0 : i32
    return %c0_i32, %c0_i32_0 : i32, i32
  }
  func.func @transform_6(%arg0: i32, %arg1: i32) -> (i32, i32) {
    %c0_i32 = arith.constant 0 : i32
    %c0_i32_0 = arith.constant 0 : i32
    %c0_i32_1 = arith.constant 0 : i32
    return %c0_i32, %c0_i32_0 : i32, i32
  }
  func.func @transform_7(%arg0: i32, %arg1: i32) -> (i32, i32, i32) {
    %c0_i32 = arith.constant 0 : i32
    %c0_i32_0 = arith.constant 0 : i32
    return %arg0, %arg1, %c0_i32 : i32, i32, i32
  }
  func.func @transform_8(%arg0: i32, %arg1: i32) -> (i32, i32, i32) {
    %c0_i32 = arith.constant 0 : i32
    %c0_i32_0 = arith.constant 0 : i32
    return %arg0, %arg1, %c0_i32 : i32, i32, i32
  }
}

</mosaic_0001>

<bundles_post_ra>
// kernel: tpu_custom_call.1
= control target key start
LH: loop header
LB: loop body
LE: loop exit
PB: predicated region body
PF: predicated region fallthrough
CT: control target
= control target key end

     0   :  { %s2689_s27 = smov 0   ;;  %s2691_s28 = smov 0   ;;  %s3084_s0 = inlined_call_operand.vmem [shape: bf16[2,10,10,32], index: 0, kind: input, shape index: {}]   ;;  %s3085_s1 = inlined_call_operand.vmem [shape: bf16[3,3,32,16], index: 1, kind: input, shape index: {}]   ;;  %s3086_s2 = inlined_call_operand.vmem [shape: f32[1,16], index: 2, kind: input, shape index: {}]   ;;  %s3087_s3 = inlined_call_operand.vmem [shape: f32[1,16], index: 3, kind: input, shape index: {}]   ;;  %s3088_s4 = inlined_call_operand.vmem [shape: bf16[3,3,32,16], index: 4, kind: input, shape index: {}]   ;;  %s3089_s5 = inlined_call_operand.vmem [shape: f32[1,16], index: 5, kind: input, shape index: {}]   ;;  %s3090_s6 = inlined_call_operand.vmem [shape: f32[1,16], index: 6, kind: input, shape index: {}]   ;;  %s3091_s7 = inlined_call_operand.vmem [shape: bf16[2,64,16], index: 7, kind: output, shape index: {0}]   ;;  %s3092_s8 = inlined_call_operand.vmem [shape: bf16[2,64,16], index: 8, kind: output, shape index: {1}]  }
   0x1   :  { %s2693_s29 = smov 0   ;;  %s2695_s30 = smov 0  }
   0x2   :  { %s2697_s9 = smov 0  }
   0x3 LB: > { %s28_s10 = sadd.s32 1, %s2634_s29  ;;  %s31_s11 = sadd.s32 1, %s2638_s30  ;;  %s2642_s9 = sphi %s2697_s9, %s19_s9   ;;  %s2638_s30 = sphi %s2695_s30, %s3100_s30   ;;  %s2634_s29 = sphi %s2693_s29, %s3099_s29   ;;  %s2630_s28 = sphi %s2691_s28, %s3098_s28   ;;  %s2626_s27 = sphi %s2689_s27, %s3097_s27  }
   0x4   : > { %p29_p0 = scmp.ge.s32.totalorder %s28_s10, 2  ;;  %p2050_p1 = scmp.ge.s32.totalorder %s2642_s9, 1 }
   0x5   : > { %p281_p2 = scmp.lt.s32.totalorder %s2642_s9, 5 }
   0x6   : > { %s3102_s10 = smov (%p29_p0, %s28_s10), 0  ;;  %s3104_s11 = smov (!%p29_p0, %s31_s11), %s2638_s30 }
   0x7   : > { %p282_p3 = pnand %p2050_p1, %p281_p2  ;;  %p33_p4 = scmp.ge.s32.totalorder %s3104_s11, 2 }
   0x8   : > { %v2563_v0 = vld [vmem:[%s3085_s1 + $0x10] sm:$0xff] (!%p282_p3)   ;;  %p328_p5 = scmp.lt.s32.totalorder (!%p282_p3), %s2630_s28, 1  ;;  %v2565_v2 = vld [vmem:[%s3085_s1 + $0x18] sm:$0xff] (!%p282_p3)   ;;  %s2233_s21 = sshll.u32 (!%p282_p3), %s2626_s27, 5  ;;  %v2740_v4 = vld [vmem:[%s3085_s1] sm:$0xff] (!%p282_p3)   ;;  %vm460_vm3 = vcmask (!%p282_p3), 261120  }
   0x9   : > { %s3106_s11 = smov (%p33_p4, %s3104_s11), 0  ;;  %285 = sbr.rel (%p282_p3) target bundleno = 358 (0x166), region = 48 }
   0xa   : > { %v2564_v1 = vld [vmem:[%s3088_s4 + $0x10] sm:$0xff] (!%p282_p3)   ;;  %2314 = vmatprep.subr.bf16.mxu0 (!%p282_p3), %v2563_v0  ;;  %v2566_v3 = vld [vmem:[%s3088_s4 + $0x18] sm:$0xff] (!%p282_p3)   ;;  %v2748_v5 = vld [vmem:[%s3088_s4] sm:$0xff] (!%p282_p3)   ;;  %vm378_vm0 = vsmask.f32 (!%p282_p3), 3328  ;;  %vm724_vm4 = vcmask (!%p282_p3), 1042432  }
   0xb   : > { %2330 = vmatprep.subr.bf16.mxu1 (!%p282_p3), %v2564_v1  ;;  %2315 = vmatpush3.bf16.msra.mxu0 (!%p282_p3), %v2563_v0  ;;  %vm379_vm1 = vsmask.f32 (!%p282_p3), 7440  ;;  %v2569_v57 = vld [vmem:[%s3085_s1 + $0x8] sm:$0xff] (!%p282_p3)   ;;  %v2572_v0 = vld [vmem:[%s3085_s1 + $0x20] sm:$0xff] (!%p282_p3)   ;;  %vm725_vm5 = vcmask (!%p282_p3), 1046532   ;;  %s2052_s16 = sshll.u32 (!%p282_p3), %s2626_s27, 2 }
   0xc   : > { %2331 = vmatpush3.bf16.msra.mxu1 (!%p282_p3), %v2564_v1  ;;  %2316 = vmatprep.subr.bf16.mxu0 (!%p282_p3), %v2565_v2  ;;  %vm2791_vm2 = vmor (!%p282_p3), %vm378_vm0, %vm379_vm1  ;;  %v2570_v60 = vld [vmem:[%s3088_s4 + $0x8] sm:$0xff] (!%p282_p3)   ;;  %v2573_v1 = vld [vmem:[%s3088_s4 + $0x20] sm:$0xff] (!%p282_p3)   ;;  %p336_p6 = scmp.lt.s32.totalorder (!%p282_p3), %s2052_s16, 7  ;;  %vm1859_vm7 = vcmask (!%p282_p3), 125952  }
   0xd   : > { %2332 = vmatprep.subr.bf16.mxu1 (!%p282_p3), %v2566_v3  ;;  %vm2860_vm6 = vmor (!%p282_p3), %vm724_vm4, %vm725_vm5 }
   0xf   : > { %2317 = vmatpush3.bf16.msra.mxu0 (!%p282_p3), %v2565_v2 }
  0x10   : > { %s3108_s28 = smov (!%p328_p5, %s2630_s28), 1  ;;  %2333 = vmatpush3.bf16.msra.mxu1 %v2566_v3  ;;  %2322 = vmatprep.subr.bf16.mxu0 %v2740_v4  ;;  %s3110_s16 = smov (!%p336_p6, %s2052_s16), 7 }
  0x11   : > { %s2522_s20 = smul.u32 80, %s3108_s28  ;;  %2338 = vmatprep.subr.bf16.mxu1 %v2748_v5  ;;  %s2053_s17 = sshll.u32 %s3108_s28, 3 }
  0x12   : > { %s3046_s22 = sadd.s32 %s2053_s17, %s3110_s16 }
  0x13   : > { %s332_s26 = scalar_lea.vmem %s3084_s0, %s2522_s20  ;;  %s2054_s28 = sshll.u32 %s3046_s22, 2 }
  0x14   : > { %s2750_s14 = scalar_lea.vmem %s332_s26, %s2233_s21  ;;  %s341_s13 = scalar_lea.vmem %s3091_s7, %s2054_s28 }
  0x15   : > { %v2754_v6 = vld [vmem:[%s2750_s14] sm:$0xf]  ;;  %v2757_v7 = vld [vmem:[%s2750_s14 + $0x4] sm:$0x1]  ;;  %v2760_v8 = vld [vmem:[%s2750_s14 + $0x8] sm:$0xf]  ;;  %s351_s16 = scalar_lea.vmem %s3092_s8, %s2054_s28 }
  0x16   : > { %v2764_v9 = vld [vmem:[%s2750_s14 + $0xc] sm:$0x1]  ;;  %v2767_v10 = vld [vmem:[%s2750_s14 + $0x10] sm:$0xf]  ;;  %v2770_v11 = vld [vmem:[%s2750_s14 + $0x14] sm:$0x1]  ;;  %v2071_v62 = vcombine.low %v2754_v6, %v2760_v8 }
  0x17   : > { %v2773_v12 = vld [vmem:[%s2750_s14 + $0x18] sm:$0xf]  ;;  %v382_v13 = vshrl.u32 %v2754_v6, 16  ;;  %v385_v14 = vshll.u32 %v2754_v6, 16  ;;  %v391_v15 = vshll.u32 %v2757_v7, 16  ;;  %v396_v16 = vshrl.u32 %v2760_v8, 16 }
  0x18   : > { %v399_v17 = vshll.u32 %v2760_v8, 16  ;;  %v405_v18 = vshll.u32 %v2764_v9, 16  ;;  %v410_v19 = vshrl.u32 %v2767_v10, 16  ;;  %v413_v20 = vshll.u32 %v2767_v10, 16  ;;  %v2784_v21 = vld [vmem:[%s2750_s14 + $0x1c] sm:$0x1] }
  0x19   : > { %v384_v22 = vrot.slane %v382_v13, 4  ;;  %v387_v23 = vrot.slane %v385_v14, 5  ;;  %v398_v24 = vrot.slane %v396_v16, 4  ;;  %v393_v25 = vrot.slane %v391_v15, 5  ;;  %v369_v47 = vld [vmem:[%s2750_s14 + $0x2c] sm:$0x1] }
  0x1a   : > { %v401_v26 = vrot.slane %v399_v17, 5  ;;  %v412_v27 = vrot.slane %v410_v19, 4  ;;  %v415_v28 = vrot.slane %v413_v20, 5  ;;  %v419_v30 = vshll.u32 %v2770_v11, 16  ;;  %v2804_v49 = vld [vmem:[%s2750_s14 + $0x28] sm:$0xf] }
  0x1b   : > { %v388_v29 = vor.u32 %v387_v23, %v384_v22  ;;  %v424_v31 = vshrl.u32 %v2773_v12, 16  ;;  %v427_v32 = vshll.u32 %v2773_v12, 16  ;;  %v407_v35 = vrot.slane %v405_v18, 5  ;;  %v2575_v20 = vld [vmem:[%s3085_s1 + $0x28] sm:$0xff]  }
  0x1c   : > { %v402_v34 = vor.u32 %v401_v26, %v398_v24  ;;  %v416_v36 = vor.u32 %v415_v28, %v412_v27  ;;  %v433_v37 = vshll.u32 %v2784_v21, 16  ;;  %v421_v39 = vrot.slane %v419_v30, 5  ;;  %v2576_v22 = vld [vmem:[%s3088_s4 + $0x28] sm:$0xff]   ;;  %v2577_v26 = vld [vmem:[%s3085_s1 + $0x30] sm:$0xff]  }
  0x1d   : > { %v389_v38 = vrot.slane %v388_v29, 4  ;;  %v426_v40 = vrot.slane %v424_v31, 4  ;;  %v429_v41 = vrot.slane %v427_v32, 5  ;;  %v1509_v53 = vshrl.u32 %v2804_v49, 16  ;;  %v2579_v31 = vld [vmem:[%s3085_s1 + $0x38] sm:$0xff]  }
  0x1e   : > { %v403_v42 = vrot.slane %v402_v34, 4  ;;  %v417_v43 = vrot.slane %v416_v36, 4  ;;  %v435_v46 = vrot.slane %v433_v37, 5  ;;  %v1512_v55 = vshll.u32 %v2804_v49, 16  ;;  %v2580_v32 = vld [vmem:[%s3088_s4 + $0x38] sm:$0xff]  }
  0x1f   : > { %v394_v44 = vsel %vm2791_vm2, %v389_v38, %v393_v25  ;;  %v430_v45 = vor.u32 %v429_v41, %v426_v40  ;;  %v1518_v56 = vshll.u32 %v369_v47, 16  ;;  %v1511_v59 = vrot.slane %v1509_v53, 4  ;;  %v367_v40 = vld [vmem:[%s2750_s14 + $0x24] sm:$0x1]  ;;  %v2589_v53 = vld [vmem:[%s3085_s1 + $0x58] sm:$0xff]  }
  0x20   : > { %v2801_v48 = vsel %vm2791_vm2, %v403_v42, %v407_v35  ;;  %v2808_v50 = vsel %vm2791_vm2, %v417_v43, %v421_v39  ;;  %v1514_v61 = vrot.slane %v1512_v55, 5  ;;  %v729_v3 = vrot.slane %v2757_v7, 5  ;;  %v2919_v35 = vld [vmem:[%s2750_s14 + $0x20] sm:$0xf]  ;;  %v2590_v55 = vld [vmem:[%s3088_s4 + $0x58] sm:$0xff]  }
  0x21   : > { %v431_v51 = vrot.slane %v430_v45, 4  ;;  %v2065_v52 = vcombine.low %v394_v44, %v2801_v48  ;;  %v2831_v63 = vrot.slane %v1518_v56, 5  ;;  %v733_v13 = vrot.slane %v2764_v9, 5  ;;  %v2585_v44 = vld [vmem:[%s3085_s1 + $0x48] sm:$0xff]  }
  0x22   : > { %v1515_v2 = vor.u32 %v1514_v61, %v1511_v59  ;;  %v2089_v15 = vrot.slane %v2754_v6, 9  ;;  %v2090_v16 = vrot.slane %v2760_v8, 9  ;;  %v1670_v9 = vrot.slane %v369_v47, 5  ;;  %v2586_v45 = vld [vmem:[%s3088_s4 + $0x48] sm:$0xff]  }
  0x23   : > { %v2814_v54 = vsel %vm2791_vm2, %v431_v51, %v435_v46  ;;  %2318 = vmatprep.mubr.msk.bf16.mxu0 %vm460_vm3, %v2065_v52  ;;  %2334 = vmatprep.mubr.msk.bf16.mxu1 %vm460_vm3, %v2065_v52  ;;  %v2870_v17 = vcombine.low %v2767_v10, %v2773_v12  ;;  %v737_v23 = vrot.slane %v2770_v11, 5  ;;  %v741_v25 = vrot.slane %v2784_v21, 5  ;;  %v2578_v21 = vld [vmem:[%s3088_s4 + $0x30] sm:$0xff]  }
  0x24   : > { %v2824_v58 = vcombine.low %v2808_v50, %v2814_v54  ;;  %v2847_v14 = vrot.slane %v1515_v2, 4  ;;  %v730_v18 = vsel %vm2860_vm6, %v2089_v15, %v729_v3  ;;  %v2876_v19 = vsel %vm2860_vm6, %v2090_v16, %v733_v13  ;;  %v2588_v52 = vld [vmem:[%s3088_s4 + $0x50] sm:$0xff]   ;;  %v2598_v15 = vld [vmem:[%s3085_s1 + $0x78] sm:$0xff]  }
  0x25   : > { %v2097_v24 = vcombine.low %v730_v18, %v2876_v19  ;;  %v2091_v27 = vrot.slane %v2767_v10, 9  ;;  %v2092_v11 = vrot.slane %v2773_v12, 9  ;;  %v2115_v34 = vcombine.low %v2760_v8, %v2767_v10  ;;  %v2582_v8 = vld [vmem:[%s3085_s1 + $0x40] sm:$0xff]   ;;  %v2595_v2 = vld [vmem:[%s3085_s1 + $0x70] sm:$0xff]   ;;  %v2599_v16 = vld [vmem:[%s3088_s4 + $0x78] sm:$0xff]  }
  0x26   : > { %2319 = vmatmul.mubr.msk.bf16.vlgmr.msra.gmra.mrb[0].mxu0 %vm460_vm3, %v2824_v58  ;;  %2335 = vmatmul.mubr.msk.bf16.vlgmr.msra.gmra.mrb[0].mxu1 %vm460_vm3, %v2824_v58  ;;  %v1046_v36 = vshrl.u32 %v2919_v35, 16  ;;  %v1049_v37 = vshll.u32 %v2919_v35, 16  ;;  %v2583_v10 = vld [vmem:[%s3088_s4 + $0x40] sm:$0xff]   ;;  %v2116_v41 = vcombine.low %v2773_v12, %v2919_v35  ;;  %v1055_v43 = vshll.u32 %v367_v40, 16  ;;  %v2587_v12 = vld [vmem:[%s3085_s1 + $0x50] sm:$0xff]  }
  0x27   : > { %2323 = vmatpush3.bf16.msra.mxu0 %v2740_v4  ;;  %2339 = vmatpush3.bf16.msra.mxu1 %v2748_v5  ;;  %v2200_v4 = vrot.slane %v2804_v49, 9  ;;  %v1521_v5 = vsel %vm2791_vm2, %v2847_v14, %v2831_v63  ;;  %v738_v28 = vsel %vm2860_vm6, %v2091_v27, %v737_v23  ;;  %v2905_v29 = vsel %vm2860_vm6, %v2092_v11, %v741_v25  ;;  %v2596_v3 = vld [vmem:[%s3088_s4 + $0x70] sm:$0xff]   ;;  %v2224_v63 = vld [vmem:[%s3089_s5] ss:$0 sm:$0xff] }
  0x28   : > { %2324 = vmatprep.subr.bf16.mxu0 %v2569_v57  ;;  %2340 = vmatprep.subr.bf16.mxu1 %v2570_v60  ;;  %v2908_v30 = vcombine.low %v738_v28, %v2905_v29  ;;  %v1048_v38 = vrot.slane %v1046_v36, 4  ;;  %v1051_v39 = vrot.slane %v1049_v37, 5  ;;  %v2133_v46 = vcombine.low %v2801_v48, %v2808_v50  ;;  %v2225_v18 = vld [vmem:[%s3090_s6] ss:$0 sm:$0xff] }
  0x29   : > { %2326 = vmatprep.mubr.msk.bf16.mxu0 %vm460_vm3, %v2071_v62  ;;  %2342 = vmatprep.mubr.msk.bf16.mxu1 %vm460_vm3, %v2071_v62  ;;  %v2866_v6 = vsel %vm2860_vm6, %v2200_v4, %v1670_v9  ;;  %v1057_v51 = vrot.slane %v1055_v43, 5  ;;  %v2152_v56 = vcombine.low %v2876_v19, %v738_v28  ;;  %v2147_v59 = vrot.slane %v2919_v35, 9  ;;  %v2601_v4 = vld [vmem:[%s3088_s4 + $0x80] sm:$0xff]   ;;  %v2602_v9 = vld [vmem:[%s3085_s1 + $0x88] sm:$0xff]  }
  0x2a   : > { %v1052_v42 = vor.u32 %v1051_v39, %v1048_v38  ;;  %v2170_v13 = vcombine.low %v2919_v35, %v2804_v49  ;;  %v2600_v49 = vld [vmem:[%s3085_s1 + $0x80] sm:$0xff]  }
  0x2b   : > { %2325 = vmatpush3.bf16.msra.mxu0 %v2569_v57  ;;  %2341 = vmatpush3.bf16.msra.mxu1 %v2570_v60  ;;  %v1211_v57 = vrot.slane %v367_v40, 5  ;;  %v2592_v60 = vld [vmem:[%s3088_s4 + $0x60] sm:$0xff]  }
  0x2c   : > { %2346 = vmatprep.subr.bf16.mxu0 %v2572_v0  ;;  %2354 = vmatprep.subr.bf16.mxu1 %v2573_v1  ;;  %v1053_v47 = vrot.slane %v1052_v42, 4 }
  0x2d   : > { %v1212_v61 = vsel %vm2860_vm6, %v2147_v59, %v1211_v57 }
  0x2e   : > { %v1058_v48 = vsel %vm2791_vm2, %v1053_v47, %v1057_v51  ;;  %v2153_v62 = vcombine.low %v2905_v29, %v1212_v61  ;;  %v2205_v33 = vcombine.low %v1212_v61, %v2866_v6 }
  0x2f   : > { %v2134_v50 = vcombine.low %v2814_v54, %v1058_v48  ;;  %v2591_v54 = vld [vmem:[%s3085_s1 + $0x60] sm:$0xff]   ;;  %v2187_v7 = vcombine.low %v1058_v48, %v1521_v5 }
  0x30   : > { %v2219_v5 = vld [vmem:[%s3087_s3] ss:$0 sm:$0xff] }
  0x32   : > { %2327 = vmatmul.mubr.msk.bf16.vlgmr.msra.gmra.mrb[0].mxu0 %vm460_vm3, %v2870_v17  ;;  %2343 = vmatmul.mubr.msk.bf16.vlgmr.msra.gmra.mrb[0].mxu1 %vm460_vm3, %v2870_v17 }
  0x33   : > { %2347 = vmatpush3.bf16.msra.mxu0 %v2572_v0  ;;  %2355 = vmatpush3.bf16.msra.mxu1 %v2573_v1  ;;  %v2593_v0 = vld [vmem:[%s3085_s1 + $0x68] sm:$0xff]  }
  0x34   : > { %2348 = vmatprep.subr.bf16.mxu0 %v2575_v20  ;;  %2356 = vmatprep.subr.bf16.mxu1 %v2576_v22  ;;  %v2594_v1 = vld [vmem:[%s3088_s4 + $0x68] sm:$0xff]  }
  0x35   : > { %2350 = vmatprep.mubr.msk.bf16.mxu0 %vm460_vm3, %v2097_v24  ;;  %2358 = vmatprep.mubr.msk.bf16.mxu1 %vm460_vm3, %v2097_v24 }
  0x37   : > { %2349 = vmatpush3.bf16.msra.mxu0 %v2575_v20  ;;  %2357 = vmatpush3.bf16.msra.mxu1 %v2576_v22 }
  0x38   : > { %2362 = vmatprep.subr.bf16.mxu0 %v2577_v26  ;;  %2370 = vmatprep.subr.bf16.mxu1 %v2578_v21 }
  0x3e   : > { %2351 = vmatmul.mubr.msk.bf16.vlgmr.msra.gmra.mrb[0].mxu0 %vm460_vm3, %v2908_v30  ;;  %2359 = vmatmul.mubr.msk.bf16.vlgmr.msra.gmra.mrb[0].mxu1 %vm460_vm3, %v2908_v30 }
  0x3f   : > { %2363 = vmatpush3.bf16.msra.mxu0 %v2577_v26  ;;  %2371 = vmatpush3.bf16.msra.mxu1 %v2578_v21 }
  0x40   : > { %2364 = vmatprep.subr.bf16.mxu0 %v2579_v31  ;;  %2372 = vmatprep.subr.bf16.mxu1 %v2580_v32 }
  0x41   : > { %2366 = vmatprep.mubr.msk.bf16.mxu0 %vm460_vm3, %v2115_v34  ;;  %2374 = vmatprep.mubr.msk.bf16.mxu1 %vm460_vm3, %v2115_v34 }
  0x43   : > { %2365 = vmatpush3.bf16.msra.mxu0 %v2579_v31  ;;  %2373 = vmatpush3.bf16.msra.mxu1 %v2580_v32 }
  0x44   : > { %2378 = vmatprep.subr.bf16.mxu0 %v2582_v8  ;;  %2386 = vmatprep.subr.bf16.mxu1 %v2583_v10 }
  0x4a   : > { %2367 = vmatmul.mubr.msk.bf16.vlgmr.msra.gmra.mrb[0].mxu0 %vm460_vm3, %v2116_v41  ;;  %2375 = vmatmul.mubr.msk.bf16.vlgmr.msra.gmra.mrb[0].mxu1 %vm460_vm3, %v2116_v41 }
  0x4b   : > { %2379 = vmatpush3.bf16.msra.mxu0 %v2582_v8  ;;  %2387 = vmatpush3.bf16.msra.mxu1 %v2583_v10 }
  0x4c   : > { %2380 = vmatprep.subr.bf16.mxu0 %v2585_v44  ;;  %2388 = vmatprep.subr.bf16.mxu1 %v2586_v45 }
  0x4d   : > { %2382 = vmatprep.mubr.msk.bf16.mxu0 %vm460_vm3, %v2133_v46  ;;  %2390 = vmatprep.mubr.msk.bf16.mxu1 %vm460_vm3, %v2133_v46 }
  0x4f   : > { %2381 = vmatpush3.bf16.msra.mxu0 %v2585_v44  ;;  %2389 = vmatpush3.bf16.msra.mxu1 %v2586_v45 }
  0x50   : > { %2394 = vmatprep.subr.bf16.mxu0 %v2587_v12  ;;  %2402 = vmatprep.subr.bf16.mxu1 %v2588_v52 }
  0x56   : > { %2383 = vmatmul.mubr.msk.bf16.vlgmr.msra.gmra.mrb[0].mxu0 %vm460_vm3, %v2134_v50  ;;  %2391 = vmatmul.mubr.msk.bf16.vlgmr.msra.gmra.mrb[0].mxu1 %vm460_vm3, %v2134_v50 }
  0x57   : > { %2395 = vmatpush3.bf16.msra.mxu0 %v2587_v12  ;;  %2403 = vmatpush3.bf16.msra.mxu1 %v2588_v52 }
  0x58   : > { %2396 = vmatprep.subr.bf16.mxu0 %v2589_v53  ;;  %2404 = vmatprep.subr.bf16.mxu1 %v2590_v55 }
  0x59   : > { %2398 = vmatprep.mubr.msk.bf16.mxu0 %vm460_vm3, %v2152_v56  ;;  %2406 = vmatprep.mubr.msk.bf16.mxu1 %vm460_vm3, %v2152_v56 }
  0x5b   : > { %2397 = vmatpush3.bf16.msra.mxu0 %v2589_v53  ;;  %2405 = vmatpush3.bf16.msra.mxu1 %v2590_v55 }
  0x5c   : > { %2410 = vmatprep.subr.bf16.mxu0 %v2591_v54  ;;  %2418 = vmatprep.subr.bf16.mxu1 %v2592_v60 }
  0x62   : > { %2399 = vmatmul.mubr.msk.bf16.vlgmr.msra.gmra.mrb[0].mxu0 %vm460_vm3, %v2153_v62  ;;  %2407 = vmatmul.mubr.msk.bf16.vlgmr.msra.gmra.mrb[0].mxu1 %vm460_vm3, %v2153_v62 }
  0x63   : > { %2411 = vmatpush3.bf16.msra.mxu0 %v2591_v54  ;;  %2419 = vmatpush3.bf16.msra.mxu1 %v2592_v60 }
  0x64   : > { %2412 = vmatprep.subr.bf16.mxu0 %v2593_v0  ;;  %2420 = vmatprep.subr.bf16.mxu1 %v2594_v1 }
  0x65   : > { %2414 = vmatprep.mubr.msk.bf16.mxu0 %vm460_vm3, %v2870_v17  ;;  %2422 = vmatprep.mubr.msk.bf16.mxu1 %vm460_vm3, %v2870_v17  ;;  %v2603_v17 = vld [vmem:[%s3088_s4 + $0x88] sm:$0xff]  }
  0x67   : > { %2413 = vmatpush3.bf16.msra.mxu0 %v2593_v0  ;;  %2421 = vmatpush3.bf16.msra.mxu1 %v2594_v1 }
  0x68   : > { %2426 = vmatprep.subr.bf16.mxu0 %v2595_v2  ;;  %2434 = vmatprep.subr.bf16.mxu1 %v2596_v3 }
  0x6e   : > { %2415 = vmatmul.mubr.msk.bf16.vlgmr.msra.gmra.mrb[0].mxu0 %vm460_vm3, %v2170_v13  ;;  %2423 = vmatmul.mubr.msk.bf16.vlgmr.msra.gmra.mrb[0].mxu1 %vm460_vm3, %v2170_v13 }
  0x6f   : > { %2427 = vmatpush3.bf16.msra.mxu0 %v2595_v2  ;;  %2435 = vmatpush3.bf16.msra.mxu1 %v2596_v3 }
  0x70   : > { %2428 = vmatprep.subr.bf16.mxu0 %v2598_v15  ;;  %2436 = vmatprep.subr.bf16.mxu1 %v2599_v16 }
  0x71   : > { %2430 = vmatprep.mubr.msk.bf16.mxu0 %vm460_vm3, %v2824_v58  ;;  %2438 = vmatprep.mubr.msk.bf16.mxu1 %vm460_vm3, %v2824_v58  ;;  %v2218_v58 = vld [vmem:[%s3086_s2] ss:$0 sm:$0xff] }
  0x73   : > { %2429 = vmatpush3.bf16.msra.mxu0 %v2598_v15  ;;  %2437 = vmatpush3.bf16.msra.mxu1 %v2599_v16 }
  0x74   : > { %2442 = vmatprep.subr.bf16.mxu0 %v2600_v49  ;;  %2450 = vmatprep.subr.bf16.mxu1 %v2601_v4 }
  0x7a   : > { %2431 = vmatmul.mubr.msk.bf16.vlgmr.msra.gmra.mrb[0].mxu0 %vm460_vm3, %v2187_v7  ;;  %2439 = vmatmul.mubr.msk.bf16.vlgmr.msra.gmra.mrb[0].mxu1 %vm460_vm3, %v2187_v7 }
  0x7b   : > { %2443 = vmatpush3.bf16.msra.mxu0 %v2600_v49  ;;  %2451 = vmatpush3.bf16.msra.mxu1 %v2601_v4 }
  0x7c   : > { %2444 = vmatprep.subr.bf16.mxu0 %v2602_v9  ;;  %2452 = vmatprep.subr.bf16.mxu1 %v2603_v17 }
  0x7d   : > { %2446 = vmatprep.mubr.msk.bf16.mxu0 %vm460_vm3, %v2908_v30  ;;  %2454 = vmatprep.mubr.msk.bf16.mxu1 %vm460_vm3, %v2908_v30 }
  0x7f   : > { %2445 = vmatpush3.bf16.msra.mxu0 %v2602_v9  ;;  %2453 = vmatpush3.bf16.msra.mxu1 %v2603_v17 }
  0x86   : > { %2447 = vmatmul.mubr.msk.bf16.vlgmr.msra.gmra.mrb[0].mxu0 %vm460_vm3, %v2205_v33  ;;  %2455 = vmatmul.mubr.msk.bf16.vlgmr.msra.gmra.mrb[0].mxu1 %vm460_vm3, %v2205_v33 }
 0x159   : > { %v2448_v14 = vpop.f32.mrb[0].mxu0  ;;  %v2456_v6 = vpop.f32.mrb[0].mxu1 }
 0x15a   : > { %v1826_v19 = vmul.f32 %v2448_v14, %v2218_v58  ;;  %v1873_v20 = vmul.f32 %v2456_v6, %v2224_v63  ;;  %v1728_v22 = vpop.f32.mrb[1].mxu0  ;;  %v1798_v23 = vpop.f32.mrb[1].mxu1 }
 0x15b   : > { %v1824_v24 = vmul.f32 %v2218_v58, %v1728_v22  ;;  %v1871_v25 = vmul.f32 %v2224_v63, %v1798_v23  ;;  %v2449_v26 = vpop.f32.mrb[2].mxu0  ;;  %v2457_v27 = vpop.f32.mrb[2].mxu1 }
 0x15c   : > { %v1837_v11 = vadd.f32 %v2219_v5, %v1826_v19  ;;  %v1884_v21 = vadd.f32 %v2225_v18, %v1873_v20  ;;  %v1827_v28 = vmul.f32 %v2449_v26, %v2218_v58  ;;  %v1874_v29 = vmul.f32 %v2457_v27, %v2224_v63  ;;  %v1731_v30 = vpop.f32.mrb[3].mxu0  ;;  %v1801_v31 = vpop.f32.mrb[3].mxu1 }
 0x15d   : > { %v1835_v32 = vadd.f32 %v2219_v5, %v1824_v24  ;;  %v1882_v34 = vadd.f32 %v2225_v18, %v1871_v25  ;;  %v1825_v35 = vmul.f32 %v2218_v58, %v1731_v30  ;;  %v1872_v36 = vmul.f32 %v2224_v63, %v1801_v31 }
 0x15e   : > { %v1841_v37 = vmax.f32 %v1837_v11, 0.0  ;;  %v1888_v8 = vmax.f32 %v1884_v21, 0.0  ;;  %v1838_v10 = vadd.f32 %v2219_v5, %v1827_v28  ;;  %v1885_v38 = vadd.f32 %v2225_v18, %v1874_v29 }
 0x15f   : > { %v1839_v39 = vmax.f32 %v1835_v32, 0.0  ;;  %v1886_v40 = vmax.f32 %v1882_v34, 0.0  ;;  %v1836_v41 = vadd.f32 %v2219_v5, %v1825_v35  ;;  %v1883_v42 = vadd.f32 %v2225_v18, %v1872_v36 }
 0x160   : > { %v2236_v43 = vpack.c.bf16 %v1841_v37, %v1841_v37  ;;  %v2240_v44 = vpack.c.bf16 %v1888_v8, %v1888_v8  ;;  %v1842_v45 = vmax.f32 %v1838_v10, 0.0  ;;  %v1889_v46 = vmax.f32 %v1885_v38, 0.0 }
 0x161   : > { %v2234_v47 = vpack.c.bf16 %v1839_v39, %v1839_v39  ;;  %v2238_v51 = vpack.c.bf16 %v1886_v40, %v1886_v40  ;;  %v1840_v12 = vmax.f32 %v1836_v41, 0.0  ;;  %v1887_v52 = vmax.f32 %v1883_v42, 0.0 }
 0x162   : > { %1862 = vst.msk [vmem:[%s341_s13 + $0x8] sm:$0xf] %vm1859_vm7, %v2236_v43  ;;  %1908 = vst.msk [vmem:[%s351_s16 + $0x8] sm:$0xf] %vm1859_vm7, %v2240_v44  ;;  %v2237_v48 = vpack.c.bf16 %v1842_v45, %v1842_v45  ;;  %v2241_v50 = vpack.c.bf16 %v1889_v46, %v1889_v46 }
 0x163   : > { %1860 = vst.msk [vmem:[%s341_s13] sm:$0xf] %vm1859_vm7, %v2234_v47  ;;  %1906 = vst.msk [vmem:[%s351_s16] sm:$0xf] %vm1859_vm7, %v2238_v51  ;;  %v2235_v53 = vpack.c.bf16 %v1840_v12, %v1840_v12  ;;  %v2239_v55 = vpack.c.bf16 %v1887_v52, %v1887_v52 }
 0x164   : > { %1863 = vst.msk [vmem:[%s341_s13 + $0xc] sm:$0xf] %vm1859_vm7, %v2237_v48  ;;  %1909 = vst.msk [vmem:[%s351_s16 + $0xc] sm:$0xf] %vm1859_vm7, %v2241_v50 }
 0x165   : > { %1861 = vst.msk [vmem:[%s341_s13 + $0x4] sm:$0xf] %vm1859_vm7, %v2235_v53  ;;  %1907 = vst.msk [vmem:[%s351_s16 + $0x4] sm:$0xf] %vm1859_vm7, %v2239_v55 }
 0x166 PF: > { %s19_s9 = sadd.s32 1, %s2642_s9   ;;  %s3097_s27 = smov %s2634_s29 }
 0x167   : > { %p16_p7 = scmp.ge.s32.totalorder %s19_s9, 6   ;;  %s3098_s28 = smov %s2638_s30 }
 0x168   : > { %s3099_s29 = smov %s3102_s10  ;;  %s3100_s30 = smov %s3106_s11 }
 0x169   :  { %18 = sbr.rel (!%p16_p7) target bundleno = 3 (0x3), region = 107 }

</bundles_post_ra>
